<compile_context>
chip_gen: v6e
topology: v6e:2x2x1
jax: 0.10.0
libtpu: 0.0.40
codegen_flags: <defaults>
</compile_context>

<pallas_src>
import functools

import jax
import jax.numpy as jnp
from jax import lax
from jax.experimental import pallas as pl
from jax.experimental.pallas import tpu as pltpu


def _adv_gen_kernel(hq_ref, hk_ref, qb_ref, kb_ref, w_ref, b_ref, gen_ref,
                    acc_ref, *, bf16_elem, d_aug):
    """One (query-tile, kv-tile) step of the flash-style bilateral filter.

    grid = (num_q_tiles "parallel", num_kv_tiles "arbitrary"). The (tq, tkv)
    similarity block is consumed immediately and never written back.
    h* tiles carry a trailing ones column, so acc[:, -1] is the row sum.
    """
    ki = pl.program_id(1)

    @pl.when(ki == 0)
    def _init():
        acc_ref[...] = jnp.zeros_like(acc_ref)

    hq = hq_ref[...]                                   # (tq,  d_aug) f32
    hk = hk_ref[...]                                   # (tkv, d_aug) f32

    # Gram via dot_general contracting the last axis of both operands (no XLU
    # transpose); stays f32 so bilateral distances keep precision.
    gram = lax.dot_general(hq, hk, (((1,), (1,)), ((), ())),
                           preferred_element_type=jnp.float32)      # (tq, tkv)

    # logits = -0.5 * ||hq - hk||^2  (qb/kb are hoisted -0.5*||h||^2 terms).
    # logits <= 0 up to rounding -> exp is numerically safe without a row max.
    logits = gram + qb_ref[...] + kb_ref[...]                        # (tq, tkv) f32
    if bf16_elem:
        e = jnp.exp(logits.astype(jnp.bfloat16))   # bf16 EUP (v6e/v7x)
    else:
        e = jnp.exp(logits)                        # f32 EUP (v5e: no bf16 VPU/EUP)

    # Value aggregation on the MXU, bf16 inputs with f32 accumulation. The ones
    # column of hk folds the row-sum (softmax denominator) into the same matmul.
    acc_ref[...] += jnp.dot(e.astype(jnp.bfloat16), hk.astype(jnp.bfloat16),
                            preferred_element_type=jnp.float32)      # (tq, d_aug)

    @pl.when(ki == pl.num_programs(1) - 1)
    def _finalize():
        acc = acc_ref[...]
        inv = pl.reciprocal(acc[:, d_aug - 1:d_aug], approx=True)    # (tq, 1) EUP
        # (acc * inv) @ w == (acc @ w) * inv (row scaling commutes); w's last row
        # is zero so the ones column never leaks into the projection.
        gen = jnp.dot(acc, w_ref[...],
                      preferred_element_type=jnp.float32) * inv + b_ref[...]
        gen_ref[...] = jnp.maximum(gen, 0.0).astype(gen_ref.dtype)   # activation=True


def _round_up(a, m):
    return -(-a // m) * m


def _choose_tiles(n, tq_req, tkv_req):
    """kv tile: multiple of 128; q tile: multiple of 8 dividing padded N."""
    n128 = _round_up(n, 128)
    tkv = min(max(128, (tkv_req // 128) * 128), n128)
    # Shrink the kv tile if padding waste would exceed ~12.5% of the problem.
    while tkv > 128 and (_round_up(n, tkv) - n) * 8 > n128:
        tkv = max(128, (tkv // 2 // 128) * 128)
    n_pad = _round_up(n, tkv)
    tq = min(max(8, (tq_req // 8) * 8), n_pad)
    while n_pad % tq != 0:
        tq -= 8
    # Give the v7x megacore at least two query tiles when the problem is tiny.
    if n_pad // tq < 2 and tq % 16 == 0:
        tq //= 2
    return tq, tkv, n_pad


@functools.partial(jax.jit, static_argnames=("tq", "tkv", "bf16_elem"))
def _adversarial_generator_v3_impl(x, noise, y, w, b, *, tq, tkv, bf16_elem):
    x = x.astype(jnp.float32)
    noise = noise.astype(jnp.float32)
    y = y.astype(jnp.float32)
    w = w.astype(jnp.float32)
    b = jnp.asarray(b, jnp.float32).reshape(1, -1)

    n, fin = x.shape
    din = fin + noise.shape[-1]
    d_aug = din + 1
    fout = w.shape[-1]
    f_pad = _round_up(fout, 128)

    tq, tkv, n_pad = _choose_tiles(n, tq, tkv)

    # torch.cat([x, noise], dim=-1) plus a trailing validity/ones column, padded
    # with all-zero rows to n_pad. Padded key rows (zero everywhere, including
    # the ones column) contribute exactly zero to acc and to the row sum.
    h_aug = jnp.concatenate([x, noise, jnp.ones((n, 1), jnp.float32)], axis=-1)
    h_aug = jnp.pad(h_aug, ((0, n_pad - n), (0, 0)))

    # Hoisted per-row bias terms (-0.5*||h||^2): O(N) XLA work fused by jit,
    # streamed to the kernel already in (tq,1) / (1,tkv) layouts.
    sq = jnp.sum(h_aug * h_aug, axis=-1)
    qb = (-0.5 * sq).reshape(n_pad, 1)
    kb = (-0.5 * sq).reshape(1, n_pad)

    # Lane-dense projection: [w; 0] with output lanes padded to 128.
    w_k = jnp.zeros((d_aug, f_pad), jnp.float32).at[:din, :fout].set(w)
    b_k = jnp.zeros((1, f_pad), jnp.float32).at[:, :fout].set(b)

    grid = (n_pad // tq, n_pad // tkv)

    gen_full = pl.pallas_call(
        functools.partial(_adv_gen_kernel, bf16_elem=bf16_elem, d_aug=d_aug),
        out_shape=jax.ShapeDtypeStruct((n_pad, f_pad), jnp.float32),
        grid_spec=pltpu.PrefetchScalarGridSpec(
            num_scalar_prefetch=0,
            grid=grid,
            in_specs=[
                pl.BlockSpec((tq, d_aug), lambda qi, ki: (qi, 0)),    # query rows
                pl.BlockSpec((tkv, d_aug), lambda qi, ki: (ki, 0)),   # key/value rows
                pl.BlockSpec((tq, 1), lambda qi, ki: (qi, 0)),        # -0.5*||hq||^2
                pl.BlockSpec((1, tkv), lambda qi, ki: (0, ki)),       # -0.5*||hk||^2
                pl.BlockSpec((d_aug, f_pad), lambda qi, ki: (0, 0)),  # projection
                pl.BlockSpec((1, f_pad), lambda qi, ki: (0, 0)),      # bias
            ],
            out_specs=pl.BlockSpec((tq, f_pad), lambda qi, ki: (qi, 0)),
            scratch_shapes=[
                pltpu.VMEM((tq, d_aug), jnp.float32),   # weighted sums + row sum
            ],
        ),
        compiler_params=pltpu.CompilerParams(
            dimension_semantics=("parallel", "arbitrary"),
            vmem_limit_bytes=32 * 1024 * 1024),
    )(h_aug, h_aug, qb, kb, w_k, b_k)

    gen = gen_full[:n, :fout]
    # gen_mse = mean((gen - y)^2): tiny jit-fused XLA reduction, kept out of the
    # kernel (no padded (1,1) VMEM scalar; megacore-safe under the parallel grid).
    gen_mse = jnp.mean(jnp.square(gen - y))
    return gen, gen_mse


def adversarial_generator_v3(x, noise, y, w, b, *, tq=256, tkv=1024):
    """x: (N, fin), noise: (N, add), y: (N, fin), w: (fin+add, fin), b: (1, fin).
    Returns (gen, gen_mse) matching the PyTorch module's forward outputs."""
    dk = jax.devices()[0].device_kind.lower()
    # bf16 elementwise/exp only where the VPU/EUP are bf16-capable (v6e / v7x).
    bf16_elem = any(t in dk for t in ("v6", "v7", "6e", "7x"))
    return _adversarial_generator_v3_impl(x, noise, y, w, b,
                                          tq=tq, tkv=tkv, bf16_elem=bf16_elem)


def _reference(x, noise, y, w, b):
    """Pure-JAX reference of the same dense bilateral formulation."""
    h = jnp.concatenate([x, noise], axis=-1).astype(jnp.float32)
    sq = jnp.sum(h * h, axis=-1, keepdims=True)
    d2 = jnp.maximum(sq + sq.T - 2.0 * (h @ h.T), 0.0)
    e = jnp.exp(-0.5 * d2)
    wn = e / jnp.sum(e, axis=-1, keepdims=True)
    gen = jnp.maximum((wn @ h) @ w + b, 0.0)
    return gen, jnp.mean(jnp.square(gen - y))


if __name__ == "__main__":
    # Small deterministic shapes consistent with the module:
    #   fin = 16 node features, additional_dim = 1 noise channel, N = 64 nodes.
    N, FIN, ADD = 64, 16, 1
    key = jax.random.PRNGKey(0)
    kx, kn, ky, kw, kb = jax.random.split(key, 5)

    x = jax.random.normal(kx, (N, FIN), dtype=jnp.float32)
    noise = jax.random.normal(kn, (N, ADD), dtype=jnp.float32)
    y = jax.random.normal(ky, (N, FIN), dtype=jnp.float32)

    fan_in = FIN + ADD
    w = jax.random.normal(kw, (fan_in, FIN), dtype=jnp.float32) / jnp.sqrt(jnp.float32(fan_in))
    b = jax.random.normal(kb, (1, FIN), dtype=jnp.float32) * 0.01

    gen, gen_mse = adversarial_generator_v3(x, noise, y, w, b)
    jax.block_until_ready((gen, gen_mse))

    assert gen.shape == (N, FIN)
    assert gen_mse.shape == ()

    # Correctness vs. pure-JAX reference (loose tolerance: bf16 exp on v6e/v7x,
    # bf16 value matmul with f32 accumulation, approx EUP reciprocal).
    gen_ref, mse_ref = _reference(x, noise, y, w, b)
    assert jnp.allclose(gen, gen_ref, atol=3e-2, rtol=3e-2), \
        float(jnp.max(jnp.abs(gen - gen_ref)))
    assert jnp.allclose(gen_mse, mse_ref, atol=3e-2, rtol=3e-2), \
        (float(gen_mse), float(mse_ref))

    print("KERNEL_OK")
</pallas_src>

<mosaic_0001>
module attributes {stable_mosaic.version = 11 : i64} {
  func.func @_adv_gen_kernel(%arg0: i32, %arg1: i32, %arg2: memref<64x18xf32, #tpu.memory_space<vmem>>, %arg3: memref<128x18xf32, #tpu.memory_space<vmem>>, %arg4: memref<64x1xf32, #tpu.memory_space<vmem>>, %arg5: memref<1x128xf32, #tpu.memory_space<vmem>>, %arg6: memref<18x128xf32, #tpu.memory_space<vmem>>, %arg7: memref<1x128xf32, #tpu.memory_space<vmem>>, %arg8: memref<64x128xf32, #tpu.memory_space<vmem>>, %arg9: memref<64x18xf32, #tpu.memory_space<vmem>>) attributes {dimension_semantics = [#tpu.dimension_semantics<parallel>, #tpu.dimension_semantics<arbitrary>], iteration_bounds = array<i64: 2, 1>, scalar_prefetch = 0 : i64, scratch_operands = 1 : i64, tpu.core_type = #tpu.core_type<tc>, window_params = [{transform_indices = @transform_0, window_bounds = array<i64: 64, 18>}, {transform_indices = @transform_1, window_bounds = array<i64: 128, 18>}, {transform_indices = @transform_2, window_bounds = array<i64: 64, 1>}, {transform_indices = @transform_3, window_bounds = array<i64: 1, 128>}, {pipeline_mode = #tpu.pipeline_mode<synchronous>, transform_indices = @transform_4, window_bounds = array<i64: 18, 128>}, {pipeline_mode = #tpu.pipeline_mode<synchronous>, transform_indices = @transform_5, window_bounds = array<i64: 1, 128>}, {transform_indices = @transform_6, window_bounds = array<i64: 64, 128>}]} {
    %c0_i32 = arith.constant 0 : i32
    %0 = arith.cmpi eq, %arg1, %c0_i32 : i32
    %1 = arith.extui %0 : i1 to i32
    %c0_i32_0 = arith.constant 0 : i32
    %2 = arith.cmpi ne, %1, %c0_i32_0 : i32
    scf.if %2 {
      %cst_15 = arith.constant 0.000000e+00 : f32
      %22 = vector.broadcast %cst_15 : f32 to vector<64x18xf32>
      %c0_16 = arith.constant 0 : index
      %c0_17 = arith.constant 0 : index
      %23 = vector.load %arg9[%c0_16, %c0_17] : memref<64x18xf32, #tpu.memory_space<vmem>>, vector<64x18xf32>
      tpu.vector_store %arg9[%c0_16, %c0_17], %22 {strides = array<i32>} : memref<64x18xf32, #tpu.memory_space<vmem>>, vector<64x18xf32>,
    } else {
    }
    %c0 = arith.constant 0 : index
    %c0_1 = arith.constant 0 : index
    %3 = vector.load %arg2[%c0, %c0_1] : memref<64x18xf32, #tpu.memory_space<vmem>>, vector<64x18xf32>
    %c0_2 = arith.constant 0 : index
    %c0_3 = arith.constant 0 : index
    %4 = vector.load %arg3[%c0_2, %c0_3] : memref<128x18xf32, #tpu.memory_space<vmem>>, vector<128x18xf32>
    %cst = arith.constant dense<0.000000e+00> : vector<64x128xf32>
    %5 = tpu.matmul %3, %4, %cst {dimension_numbers = #tpu.dot_dimension_numbers<[1], [1], [0], [0], [0, 0, 1, 0], [], []>} : vector<64x18xf32>, vector<128x18xf32>, vector<64x128xf32> -> vector<64x128xf32>
    %c0_4 = arith.constant 0 : index
    %c0_5 = arith.constant 0 : index
    %6 = vector.load %arg4[%c0_4, %c0_5] : memref<64x1xf32, #tpu.memory_space<vmem>>, vector<64x1xf32>
    %7 = vector.broadcast %6 : vector<64x1xf32> to vector<64x128xf32>
    %8 = arith.addf %5, %7 : vector<64x128xf32>
    %c0_6 = arith.constant 0 : index
    %c0_7 = arith.constant 0 : index
    %9 = vector.load %arg5[%c0_6, %c0_7] : memref<1x128xf32, #tpu.memory_space<vmem>>, vector<1x128xf32>
    %10 = vector.broadcast %9 : vector<1x128xf32> to vector<64x128xf32>
    %11 = arith.addf %8, %10 : vector<64x128xf32>
    %12 = math.exp %11 : vector<64x128xf32>
    %c0_8 = arith.constant 0 : index
    %c0_9 = arith.constant 0 : index
    %13 = vector.load %arg9[%c0_8, %c0_9] : memref<64x18xf32, #tpu.memory_space<vmem>>, vector<64x18xf32>
    %14 = arith.truncf %12 : vector<64x128xf32> to vector<64x128xbf16>
    %15 = arith.truncf %4 : vector<128x18xf32> to vector<128x18xbf16>
    %cst_10 = arith.constant dense<0.000000e+00> : vector<64x18xf32>
    %16 = tpu.matmul %14, %15, %cst_10 {dimension_numbers = #tpu.dot_dimension_numbers<[1], [0], [0], [1], [0, 0, 1, 1], [], []>} : vector<64x128xbf16>, vector<128x18xbf16>, vector<64x18xf32> -> vector<64x18xf32>
    %17 = arith.addf %13, %16 : vector<64x18xf32>
    %c0_11 = arith.constant 0 : index
    %c0_12 = arith.constant 0 : index
    %18 = vector.load %arg9[%c0_11, %c0_12] : memref<64x18xf32, #tpu.memory_space<vmem>>, vector<64x18xf32>
    tpu.vector_store %arg9[%c0_11, %c0_12], %17 {strides = array<i32>} : memref<64x18xf32, #tpu.memory_space<vmem>>, vector<64x18xf32>,
    %c0_i32_13 = arith.constant 0 : i32
    %19 = arith.cmpi eq, %arg1, %c0_i32_13 : i32
    %20 = arith.extui %19 : i1 to i32
    %c0_i32_14 = arith.constant 0 : i32
    %21 = arith.cmpi ne, %20, %c0_i32_14 : i32
    scf.if %21 {
      %c0_15 = arith.constant 0 : index
      %c0_16 = arith.constant 0 : index
      %22 = vector.load %arg9[%c0_15, %c0_16] : memref<64x18xf32, #tpu.memory_space<vmem>>, vector<64x18xf32>
      %23 = vector.extract_strided_slice %22 {offsets = [0, 17], sizes = [64, 1], strides = [1, 1]} : vector<64x18xf32> to vector<64x1xf32>
      %24 = tpu.reciprocal %23 {approx = true} : vector<64x1xf32> -> vector<64x1xf32>
      %c0_17 = arith.constant 0 : index
      %c0_18 = arith.constant 0 : index
      %25 = vector.load %arg6[%c0_17, %c0_18] : memref<18x128xf32, #tpu.memory_space<vmem>>, vector<18x128xf32>
      %cst_19 = arith.constant dense<0.000000e+00> : vector<64x128xf32>
      %26 = tpu.matmul %22, %25, %cst_19 {dimension_numbers = #tpu.dot_dimension_numbers<[1], [0], [0], [1], [0, 0, 1, 1], [], []>} : vector<64x18xf32>, vector<18x128xf32>, vector<64x128xf32> -> vector<64x128xf32>
      %27 = vector.broadcast %24 : vector<64x1xf32> to vector<64x128xf32>
      %28 = arith.mulf %26, %27 : vector<64x128xf32>
      %c0_20 = arith.constant 0 : index
      %c0_21 = arith.constant 0 : index
      %29 = vector.load %arg7[%c0_20, %c0_21] : memref<1x128xf32, #tpu.memory_space<vmem>>, vector<1x128xf32>
      %30 = vector.broadcast %29 : vector<1x128xf32> to vector<64x128xf32>
      %31 = arith.addf %28, %30 : vector<64x128xf32>
      %cst_22 = arith.constant 0.000000e+00 : f32
      %32 = vector.broadcast %cst_22 : f32 to vector<64x128xf32>
      %33 = arith.maximumf %31, %32 : vector<64x128xf32>
      %c0_23 = arith.constant 0 : index
      %c0_24 = arith.constant 0 : index
      %34 = vector.load %arg8[%c0_23, %c0_24] : memref<64x128xf32, #tpu.memory_space<vmem>>, vector<64x128xf32>
      tpu.vector_store %arg8[%c0_23, %c0_24], %33 {strides = array<i32>} : memref<64x128xf32, #tpu.memory_space<vmem>>, vector<64x128xf32>,
    } else {
    }
    return
  }
  func.func @transform_0(%arg0: i32, %arg1: i32) -> (i32, i32) {
    %c0_i32 = arith.constant 0 : i32
    %c0_i32_0 = arith.constant 0 : i32
    return %arg0, %c0_i32 : i32, i32
  }
  func.func @transform_1(%arg0: i32, %arg1: i32) -> (i32, i32) {
    %c0_i32 = arith.constant 0 : i32
    %c0_i32_0 = arith.constant 0 : i32
    return %arg1, %c0_i32 : i32, i32
  }
  func.func @transform_2(%arg0: i32, %arg1: i32) -> (i32, i32) {
    %c0_i32 = arith.constant 0 : i32
    %c0_i32_0 = arith.constant 0 : i32
    return %arg0, %c0_i32 : i32, i32
  }
  func.func @transform_3(%arg0: i32, %arg1: i32) -> (i32, i32) {
    %c0_i32 = arith.constant 0 : i32
    %c0_i32_0 = arith.constant 0 : i32
    return %c0_i32, %arg1 : i32, i32
  }
  func.func @transform_4(%arg0: i32, %arg1: i32) -> (i32, i32) {
    %c0_i32 = arith.constant 0 : i32
    %c0_i32_0 = arith.constant 0 : i32
    %c0_i32_1 = arith.constant 0 : i32
    return %c0_i32, %c0_i32_0 : i32, i32
  }
  func.func @transform_5(%arg0: i32, %arg1: i32) -> (i32, i32) {
    %c0_i32 = arith.constant 0 : i32
    %c0_i32_0 = arith.constant 0 : i32
    %c0_i32_1 = arith.constant 0 : i32
    return %c0_i32, %c0_i32_0 : i32, i32
  }
  func.func @transform_6(%arg0: i32, %arg1: i32) -> (i32, i32) {
    %c0_i32 = arith.constant 0 : i32
    %c0_i32_0 = arith.constant 0 : i32
    return %arg0, %c0_i32 : i32, i32
  }
}

</mosaic_0001>

<bundles_post_ra>
// kernel: _adversarial_generator_v3_impl.1
= control target key start
LH: loop header
LB: loop body
LE: loop exit
PB: predicated region body
PF: predicated region fallthrough
CT: control target
= control target key end

     0   :  { %s1367_s21 = smov 0   ;;  %s1369_s22 = smov 0   ;;  %s1580_s0 = inlined_call_operand.vmem [shape: f32[128,18], index: 0, kind: input, shape index: {}, may-alias: {0,1}]   ;;  %s1581_s1 = inlined_call_operand.vmem [shape: f32[128,18], index: 1, kind: input, shape index: {}, may-alias: {0,1}]   ;;  %s1582_s2 = inlined_call_operand.vmem [shape: f32[128,1], index: 2, kind: input, shape index: {}]   ;;  %s1583_s3 = inlined_call_operand.vmem [shape: f32[1,128], index: 3, kind: input, shape index: {}]   ;;  %s1584_s4 = inlined_call_operand.vmem [shape: f32[18,128], index: 4, kind: input, shape index: {}]   ;;  %s1585_s5 = inlined_call_operand.vmem [shape: f32[1,128], index: 5, kind: input, shape index: {}]   ;;  %s1586_s6 = inlined_call_operand.vmem [shape: f32[128,128], index: 6, kind: output, shape index: {}]  }
   0x1   :  { %s1371_s23 = smov 0  }
   0x2 LB: > { %s28_s24 = sadd.s32 1, %s1323_s22  ;;  %p1065_p0 = scmp.ge.s32.totalorder %s1327_s23, 1  ;;  %s1327_s23 = sphi %s1371_s23, %s16_s23   ;;  %s1323_s22 = sphi %s1369_s22, %s1588_s22   ;;  %s1319_s21 = sphi %s1367_s21, %s1587_s21  }
   0x3   : > { %p30_p1 = scmp.ge.s32.totalorder %s28_s24, 2  ;;  %p255_p2 = scmp.lt.s32.totalorder %s1327_s23, 3 }
   0x5   : > { %s1590_s24 = smov (%p30_p1, %s28_s24), 0  ;;  %p256_p3 = pnand %p1065_p0, %p255_p2 }
   0x6   : > { %s1066_s29 = sshll.u32 (!%p256_p3), %s1319_s21, 3 }
   0x7   : > { %259 = sbr.rel (%p256_p3) target bundleno = 721 (0x2d1), region = 44  ;;  %p299_p4 = scmp.lt.s32.totalorder (!%p256_p3), %s1066_s29, 15 }
   0xc   : > { %vm330_vm0 = vcmask 146432   ;;  %v362_v0 = vld [vmem:[%s1581_s1 + $0x78] sm:$0xff]  ;;  %v361_v1 = vld [vmem:[%s1581_s1 + $0x70] sm:$0xff]  ;;  %v1329_v2 = vmov 0   ;;  %s1592_s29 = smov (!%p299_p4, %s1066_s29), 15  ;;  %v1397_v3 = vld [vmem:[%s1581_s1 + $0x68] sm:$0xff] }
   0xd   : > { %1156 = vmatprep.subr.msk.mxu0 %vm330_vm0, %v362_v0  ;;  %1269 = vset.pattern.permute.xlu0 %v1329_v2  ;;  %s1399_s8 = sshll.u32 %s1592_s29, 3  ;;  %v1420_v5 = vld [vmem:[%s1581_s1 + $0x60] sm:$0xff]  ;;  %v639_v8 = vpack.c.bf16 %v362_v0, %v361_v1  ;;  %v1433_v10 = vld [vmem:[%s1581_s1 + $0x58] sm:$0xff]  ;;  %v357_v13 = vld [vmem:[%s1581_s1 + $0x50] sm:$0xff]  ;;  %v1330_v41 = vmov 0.0   ;;  %vm767_vm1 = vcmask 1041408  }
   0xe   : > { %1157 = vmatpush3.xpose.msk.msra.mxu0 %vm330_vm0, %v362_v0  ;;  %1270 = vset.pattern.permute.xlu1 %v1329_v2  ;;  %s1406_s11 = scalar_lea.vmem %s1580_s0, %s1399_s8  ;;  %s1412_s14 = scalar_lea.vmem %s1582_s2, %s1399_s8  ;;  %v356_v16 = vld [vmem:[%s1581_s1 + $0x48] sm:$0xff]  ;;  %v355_v18 = vld [vmem:[%s1581_s1 + $0x40] sm:$0xff]  ;;  %v354_v19 = vld [vmem:[%s1581_s1 + $0x38] sm:$0xff]  ;;  %v638_v34 = vpack.c.bf16 %v1397_v3, %v1420_v5  ;;  %v637_v35 = vpack.c.bf16 %v1433_v10, %v357_v13  ;;  %333 = vst.msk [vmem:[#allocation2 + $0x10] sm:$0xff] %vm330_vm0, %v1330_v41 }
   0xf   : > { %1158 = vmatprep.subr.msk.mxu0 %vm330_vm0, %v361_v1  ;;  %v339_v4 = vld [vmem:[%s1406_s11] sm:$0xff]  ;;  %v365_v7 = vld [vmem:[%s1412_s14 + $0x10] sm:$0xff]  ;;  %v364_v9 = vld [vmem:[%s1412_s14 + $0x8] sm:$0xff]  ;;  %1200 = vmatprep.subr.bf16.mxu1 %v639_v8  ;;  %v636_v36 = vpack.c.bf16 %v356_v16, %v355_v18  ;;  %331 = vst.msk [vmem:[#allocation2] sm:$0xff] %vm330_vm0, %v1330_v41 }
  0x10   : > { %1188 = vmatprep.mubr.msk.f32.mxu0 %vm330_vm0, %v339_v4  ;;  %v363_v6 = vld [vmem:[%s1412_s14] sm:$0xff]  ;;  %383 = vperm.xlu1 %1270, %v365_v7   ;;  %v366_v11 = vld [vmem:[%s1412_s14 + $0x18] sm:$0xff]  ;;  %v368_v14 = vld [vmem:[%s1412_s14 + $0x28] sm:$0xff]  ;;  %332 = vst.msk [vmem:[#allocation2 + $0x8] sm:$0xff] %vm330_vm0, %v1330_v41 }
  0x11   : > { %373 = vperm.xlu0 %1269, %v363_v6   ;;  %1201 = vmatpush3.bf16.msra.mxu1 %v639_v8  ;;  %v367_v12 = vld [vmem:[%s1412_s14 + $0x20] sm:$0xff]  ;;  %v369_v15 = vld [vmem:[%s1412_s14 + $0x30] sm:$0xff]  ;;  %v370_v17 = vld [vmem:[%s1412_s14 + $0x38] sm:$0xff]  ;;  %334 = vst.msk [vmem:[#allocation2 + $0x18] sm:$0xff] %vm330_vm0, %v1330_v41  ;;  %s1561_s14 = scalar_lea.vmem %s1586_s6, %s1399_s8 }
  0x12   : > { %1159 = vmatpush3.xpose.msk.msra.mxu0 %vm330_vm0, %v361_v1  ;;  %v353_v20 = vld [vmem:[%s1581_s1 + $0x30] sm:$0xff]  ;;  %v352_v21 = vld [vmem:[%s1581_s1 + $0x28] sm:$0xff]  ;;  %v351_v22 = vld [vmem:[%s1581_s1 + $0x20] sm:$0xff]  ;;  %1202 = vmatprep.subr.bf16.mxu1 %v638_v34  ;;  %335 = vst.msk [vmem:[#allocation2 + $0x20] sm:$0xff] %vm330_vm0, %v1330_v41 }
  0x13   : > { %1160 = vmatprep.subr.msk.mxu0 %vm330_vm0, %v1397_v3  ;;  %v350_v23 = vld [vmem:[%s1581_s1 + $0x18] sm:$0xff]  ;;  %v349_v24 = vld [vmem:[%s1581_s1 + $0x10] sm:$0xff]  ;;  %v348_v25 = vld [vmem:[%s1581_s1 + $0x8] sm:$0xff]  ;;  %v635_v37 = vpack.c.bf16 %v354_v19, %v353_v20  ;;  %v634_v38 = vpack.c.bf16 %v352_v21, %v351_v22  ;;  %336 = vst.msk [vmem:[#allocation2 + $0x28] sm:$0xff] %vm330_vm0, %v1330_v41 }
  0x14   : > { %388 = vperm.xlu1 %1270, %v366_v11   ;;  %v347_v26 = vld [vmem:[%s1581_s1] sm:$0xff]  ;;  %v340_v27 = vld [vmem:[%s1406_s11 + $0x8] sm:$0xff]  ;;  %v341_v28 = vld [vmem:[%s1406_s11 + $0x10] sm:$0xff]  ;;  %v633_v39 = vpack.c.bf16 %v350_v23, %v349_v24  ;;  %337 = vst.msk [vmem:[#allocation2 + $0x30] sm:$0xff] %vm330_vm0, %v1330_v41 }
  0x15   : > { %378 = vperm.xlu0 %1269, %v364_v9   ;;  %v342_v29 = vld [vmem:[%s1406_s11 + $0x18] sm:$0xff]  ;;  %v343_v30 = vld [vmem:[%s1406_s11 + $0x20] sm:$0xff]  ;;  %v344_v31 = vld [vmem:[%s1406_s11 + $0x28] sm:$0xff]  ;;  %1203 = vmatpush3.bf16.msra.mxu1 %v638_v34  ;;  %v632_v40 = vpack.c.bf16 %v348_v25, %v347_v26  ;;  %338 = vst.msk [vmem:[#allocation2 + $0x38] sm:$0xff] %vm330_vm0, %v1330_v41  ;;  %v1331_v34 = vmov 17  }
  0x16   : > { %1161 = vmatpush3.xpose.msk.msra.mxu0 %vm330_vm0, %v1397_v3  ;;  %v345_v32 = vld [vmem:[%s1406_s11 + $0x30] sm:$0xff]  ;;  %v346_v33 = vld [vmem:[%s1406_s11 + $0x38] sm:$0xff]  ;;  %1204 = vmatprep.subr.bf16.mxu1 %v637_v35  ;;  %v1096_v47 = vld [vmem:[%s1583_s3] ss:$0 sm:$0xff] }
  0x17   : > { %1162 = vmatprep.subr.msk.mxu0 %vm330_vm0, %v1420_v5 }
  0x18   : > { %398 = vperm.xlu1 %1270, %v368_v14  }
  0x19   : > { %393 = vperm.xlu0 %1269, %v367_v12   ;;  %1205 = vmatpush3.bf16.msra.mxu1 %v637_v35  ;;  %v622_v35 = vld [vmem:[#allocation2 + $0x10] sm:$0xff] }
  0x1a   : > { %1163 = vmatpush3.xpose.msk.msra.mxu0 %vm330_vm0, %v1420_v5  ;;  %1206 = vmatprep.subr.bf16.mxu1 %v636_v36 }
  0x1b   : > { %1164 = vmatprep.subr.msk.mxu0 %vm330_vm0, %v1433_v10 }
  0x1c   : > { %408 = vperm.xlu1 %1270, %v370_v17  }
  0x1d   : > { %403 = vperm.xlu0 %1269, %v369_v15   ;;  %1207 = vmatpush3.bf16.msra.mxu1 %v636_v36 }
  0x1e   : > { %1165 = vmatpush3.xpose.msk.msra.mxu0 %vm330_vm0, %v1433_v10  ;;  %1208 = vmatprep.subr.bf16.mxu1 %v635_v37 }
  0x1f   : > { %1166 = vmatprep.subr.msk.mxu0 %vm330_vm0, %v357_v13 }
  0x20   : > { %1271 = vset.pattern.permute.xlu1 %v1331_v34 }
  0x21   : > { %1209 = vmatpush3.bf16.msra.mxu1 %v635_v37  ;;  %1272 = vset.pattern.permute.xlu0 %v1331_v34  ;;  %v620_v37 = vld [vmem:[#allocation2] sm:$0xff] }
  0x22   : > { %1167 = vmatpush3.xpose.msk.msra.mxu0 %vm330_vm0, %v357_v13  ;;  %1210 = vmatprep.subr.bf16.mxu1 %v634_v38 }
  0x23   : > { %1168 = vmatprep.subr.msk.mxu0 %vm330_vm0, %v356_v16 }
  0x25   : > { %1211 = vmatpush3.bf16.msra.mxu1 %v634_v38 }
  0x26   : > { %1169 = vmatpush3.xpose.msk.msra.mxu0 %vm330_vm0, %v356_v16  ;;  %1212 = vmatprep.subr.bf16.mxu1 %v633_v39 }
  0x27   : > { %1170 = vmatprep.subr.msk.mxu0 %vm330_vm0, %v355_v18 }
  0x29   : > { %1213 = vmatpush3.bf16.msra.mxu1 %v633_v39 }
  0x2a   : > { %1171 = vmatpush3.xpose.msk.msra.mxu0 %vm330_vm0, %v355_v18  ;;  %1214 = vmatprep.subr.bf16.mxu1 %v632_v40 }
  0x2b   : > { %1172 = vmatprep.subr.msk.mxu0 %vm330_vm0, %v354_v19 }
  0x2d   : > { %1215 = vmatpush3.bf16.msra.mxu1 %v632_v40  ;;  %v623_v40 = vld [vmem:[#allocation2 + $0x18] sm:$0xff] }
  0x2e   : > { %1173 = vmatpush3.xpose.msk.msra.mxu0 %vm330_vm0, %v354_v19 }
  0x2f   : > { %1174 = vmatprep.subr.msk.mxu0 %vm330_vm0, %v353_v20 }
  0x32   : > { %1175 = vmatpush3.xpose.msk.msra.mxu0 %vm330_vm0, %v353_v20 }
  0x33   : > { %1176 = vmatprep.subr.msk.mxu0 %vm330_vm0, %v352_v21 }
  0x36   : > { %1177 = vmatpush3.xpose.msk.msra.mxu0 %vm330_vm0, %v352_v21 }
  0x37   : > { %1178 = vmatprep.subr.msk.mxu0 %vm330_vm0, %v351_v22 }
  0x3a   : > { %1179 = vmatpush3.xpose.msk.msra.mxu0 %vm330_vm0, %v351_v22 }
  0x3b   : > { %1180 = vmatprep.subr.msk.mxu0 %vm330_vm0, %v350_v23 }
  0x3e   : > { %1181 = vmatpush3.xpose.msk.msra.mxu0 %vm330_vm0, %v350_v23 }
  0x3f   : > { %1182 = vmatprep.subr.msk.mxu0 %vm330_vm0, %v349_v24 }
  0x42   : > { %1183 = vmatpush3.xpose.msk.msra.mxu0 %vm330_vm0, %v349_v24 }
  0x43   : > { %1184 = vmatprep.subr.msk.mxu0 %vm330_vm0, %v348_v25 }
  0x46   : > { %1185 = vmatpush3.xpose.msk.msra.mxu0 %vm330_vm0, %v348_v25 }
  0x47   : > { %1186 = vmatprep.subr.msk.mxu0 %vm330_vm0, %v347_v26 }
  0x4a   : > { %1187 = vmatpush3.xpose.msk.msra.mxu0 %vm330_vm0, %v347_v26 }
  0x4d   : > { %1189 = vmatmul.mubr.msk.f32.vlgmr.msra.gmra.mxu0 %vm330_vm0, %v340_v27 }
  0x4e   : > { %1191 = vmatprep.mubr.msk.f32.mxu0 %vm330_vm0, %v341_v28 }
  0x51   : > { %1192 = vmatmul.mubr.msk.f32.gmra.mxu0 %vm330_vm0, %v342_v29 }
  0x52   : > { %1194 = vmatprep.mubr.msk.f32.mxu0 %vm330_vm0, %v343_v30 }
  0x55   : > { %1195 = vmatmul.mubr.msk.f32.gmra.mxu0 %vm330_vm0, %v344_v31  ;;  %v742_v31 = vld [vmem:[%s1584_s4 + $0x10] sm:$0x3] }
  0x56   : > { %1197 = vmatprep.mubr.msk.f32.mxu0 %vm330_vm0, %v345_v32  ;;  %1224 = vmatprep.subr.msk.mxu1 %vm767_vm1, %v742_v31  ;;  %v741_v32 = vld [vmem:[%s1584_s4 + $0x8] sm:$0xff] }
  0x59   : > { %1198 = vmatmul.mubr.msk.f32.gmra.mxu0 %vm330_vm0, %v346_v33  ;;  %v740_v33 = vld [vmem:[%s1584_s4] sm:$0xff] }
  0x8b   : > { %v384_v43 = vpop.permute.xlu1 %383 }
  0x8c   : > { %v374_v42 = vpop.permute.xlu0 %373 }
  0x8f   : > { %v389_v45 = vpop.permute.xlu1 %388 }
  0x90   : > { %v379_v44 = vpop.permute.xlu0 %378 }
  0x93   : > { %v399_v56 = vpop.permute.xlu1 %398 }
  0x94   : > { %v394_v61 = vpop.permute.xlu0 %393 }
  0x97   : > { %v409_v6 = vpop.permute.xlu1 %408 }
  0x98   : > { %v404_v11 = vpop.permute.xlu0 %403 }
 0x10d   : > { %v1190_v46 = vpop.f32.mrf.mxu0 }
 0x10e   : > { %v556_v48 = vadd.f32 %v1190_v46, %v379_v44  ;;  %v626_v46 = vld [vmem:[#allocation2 + $0x30] sm:$0xff] }
 0x10f   : > { %v550_v49 = vpop.f32.mrf.mxu0 }
 0x110   : > { %v597_v50 = vadd.f32 %v1096_v47, %v556_v48  ;;  %v551_v51 = vadd.f32 %v550_v49, %v374_v42  ;;  %v624_v49 = vld [vmem:[#allocation2 + $0x20] sm:$0xff] }
 0x111   : > { %v1193_v52 = vpop.f32.mrf.mxu0 }
 0x112   : > { %v606_v53 = vmul.f32 1.442695, %v597_v50  ;;  %v596_v54 = vadd.f32 %v1096_v47, %v551_v51  ;;  %v566_v55 = vadd.f32 %v1193_v52, %v389_v45  ;;  %v627_v52 = vld [vmem:[#allocation2 + $0x38] sm:$0xff] }
 0x113   : > { %v560_v57 = vpop.f32.mrf.mxu0 }
 0x114   : > { %v604_v58 = vmul.f32 1.442695, %v596_v54  ;;  %v599_v59 = vadd.f32 %v1096_v47, %v566_v55  ;;  %v561_v60 = vadd.f32 %v560_v57, %v384_v43  ;;  %1273 = vpow2.f32 %v606_v53  ;;  %v621_v43 = vld [vmem:[#allocation2 + $0x8] sm:$0xff] }
 0x115   : > { %v1196_v62 = vpop.f32.mrf.mxu0  ;;  %v625_v57 = vld [vmem:[#allocation2 + $0x28] sm:$0xff] }
 0x116   : > { %1275 = vpow2.f32 %v604_v58  ;;  %v610_v63 = vmul.f32 1.442695, %v599_v59  ;;  %v598_v0 = vadd.f32 %v1096_v47, %v561_v60  ;;  %v576_v1 = vadd.f32 %v1196_v62, %v399_v56 }
 0x117   : > { %v570_v2 = vpop.f32.mrf.mxu0 }
 0x118   : > { %v608_v3 = vmul.f32 1.442695, %v598_v0  ;;  %v601_v4 = vadd.f32 %v1096_v47, %v576_v1  ;;  %v571_v5 = vadd.f32 %v570_v2, %v394_v61  ;;  %1277 = vpow2.f32 %v610_v63 }
 0x119   : > { %v1199_v7 = vpop.f32.mrf.mxu0 }
 0x11a   : > { %1279 = vpow2.f32 %v608_v3  ;;  %v614_v8 = vmul.f32 1.442695, %v601_v4  ;;  %v600_v9 = vadd.f32 %v1096_v47, %v571_v5  ;;  %v586_v10 = vadd.f32 %v1199_v7, %v409_v6 }
 0x11b   : > { %v580_v12 = vpop.f32.mrf.mxu0 }
 0x11c   : > { %v612_v13 = vmul.f32 1.442695, %v600_v9  ;;  %v603_v14 = vadd.f32 %v1096_v47, %v586_v10  ;;  %v581_v15 = vadd.f32 %v580_v12, %v404_v11  ;;  %1281 = vpow2.f32 %v614_v8 }
 0x11e   : > { %1283 = vpow2.f32 %v612_v13  ;;  %v618_v16 = vmul.f32 1.442695, %v603_v14  ;;  %v602_v17 = vadd.f32 %v1096_v47, %v581_v15  ;;  %v1106_v15 = vld [vmem:[%s1585_s5] ss:$0 sm:$0xff] }
 0x120   : > { %v616_v18 = vmul.f32 1.442695, %v602_v17  ;;  %1285 = vpow2.f32 %v618_v16 }
 0x121   : > { %v1274_v19 = vpop.eup %1273 }
 0x122   : > { %1287 = vpow2.f32 %v616_v18 }
 0x123   : > { %v1276_v20 = vpop.eup %1275 }
 0x124   : > { %v628_v21 = vpack.c.bf16 %v1274_v19, %v1276_v20 }
 0x125   : > { %v1278_v22 = vpop.eup %1277 }
 0x126   : > { %1216 = vmatprep.mubr.bf16.mxu1 %v628_v21 }
 0x127   : > { %v1280_v23 = vpop.eup %1279 }
 0x128   : > { %v629_v24 = vpack.c.bf16 %v1278_v22, %v1280_v23 }
 0x129   : > { %v1282_v25 = vpop.eup %1281 }
 0x12a   : > { %1217 = vmatmul.mubr.bf16.vlgmr.msra.gmra.mxu1 %v629_v24 }
 0x12b   : > { %v1284_v26 = vpop.eup %1283  ;;  %1225 = vmatpush3.msk.msra.mxu1 %vm767_vm1, %v742_v31 }
 0x12c   : > { %v630_v27 = vpack.c.bf16 %v1282_v25, %v1284_v26  ;;  %1226 = vmatprep.subr.mxu1 %v741_v32 }
 0x12d   : > { %v1286_v28 = vpop.eup %1285  ;;  %1227 = vmatpush3.msra.mxu1 %v741_v32 }
 0x12e   : > { %1220 = vmatprep.mubr.bf16.mxu1 %v630_v27  ;;  %1228 = vmatprep.subr.mxu1 %v740_v33 }
 0x12f   : > { %v1288_v29 = vpop.eup %1287  ;;  %1229 = vmatpush3.msra.mxu1 %v740_v33 }
 0x130   : > { %v631_v30 = vpack.c.bf16 %v1286_v28, %v1288_v29 }
 0x132   : > { %1221 = vmatmul.mubr.bf16.gmra.mxu1 %v631_v30 }
 0x1ea   : > { %v1218_v36 = vpop.f32.mrf.mxu1 }
 0x1eb   : > { %v707_v38 = vadd.f32 %v1218_v36, %v622_v35 }
 0x1ec   : > { %v674_v39 = vpop.f32.mrf.mxu1 }
 0x1ed   : > { %715 = vst.msk [vmem:[#allocation2 + $0x10] sm:$0xff] %vm330_vm0, %v707_v38  ;;  %v705_v41 = vadd.f32 %v674_v39, %v620_v37 }
 0x1ee   : > { %v1219_v42 = vpop.f32.mrf.mxu1 }
 0x1ef   : > { %713 = vst.msk [vmem:[#allocation2] sm:$0xff] %vm330_vm0, %v705_v41  ;;  %v708_v44 = vadd.f32 %v1219_v42, %v623_v40 }
 0x1f0   : > { %v677_v45 = vpop.f32.mrf.mxu1 }
 0x1f1   : > { %716 = vst.msk [vmem:[#allocation2 + $0x18] sm:$0xff] %vm330_vm0, %v708_v44  ;;  %v706_v47 = vadd.f32 %v677_v45, %v621_v43 }
 0x1f2   : > { %v1222_v48 = vpop.f32.mrf.mxu1 }
 0x1f3   : > { %714 = vst.msk [vmem:[#allocation2 + $0x8] sm:$0xff] %vm330_vm0, %v706_v47  ;;  %v711_v50 = vadd.f32 %v1222_v48, %v626_v46 }
 0x1f4   : > { %v690_v51 = vpop.f32.mrf.mxu1  ;;  %v726_v53 = vld [vmem:[#allocation2 + $0x10] sm:$0xff] }
 0x1f5   : > { %719 = vst.msk [vmem:[#allocation2 + $0x30] sm:$0xff] %vm330_vm0, %v711_v50  ;;  %v709_v54 = vadd.f32 %v690_v51, %v624_v49  ;;  %1289 = vrcp.f32 %v726_v53 }
 0x1f6   : > { %v1223_v55 = vpop.f32.mrf.mxu1  ;;  %v724_v56 = vld [vmem:[#allocation2] sm:$0xff] }
 0x1f7   : > { %717 = vst.msk [vmem:[#allocation2 + $0x20] sm:$0xff] %vm330_vm0, %v709_v54  ;;  %v712_v58 = vadd.f32 %v1223_v55, %v627_v52  ;;  %1291 = vrcp.f32 %v724_v56  ;;  %1230 = vmatprep.mubr.msk.f32.mxu1 %vm330_vm0, %v724_v56 }
 0x1f8   : > { %v693_v59 = vpop.f32.mrf.mxu1  ;;  %v727_v60 = vld [vmem:[#allocation2 + $0x18] sm:$0xff] }
 0x1f9   : > { %720 = vst.msk [vmem:[#allocation2 + $0x38] sm:$0xff] %vm330_vm0, %v712_v58  ;;  %v710_v61 = vadd.f32 %v693_v59, %v625_v57  ;;  %1293 = vrcp.f32 %v727_v60 }
 0x1fa   : > { %v725_v62 = vld [vmem:[#allocation2 + $0x8] sm:$0xff] }
 0x1fb   : > { %718 = vst.msk [vmem:[#allocation2 + $0x28] sm:$0xff] %vm330_vm0, %v710_v61  ;;  %1295 = vrcp.f32 %v725_v62  ;;  %1231 = vmatmul.mubr.msk.f32.vlgmr.msra.gmra.mxu1 %vm330_vm0, %v725_v62 }
 0x1fc   : > { %1233 = vmatprep.mubr.msk.f32.mxu1 %vm330_vm0, %v726_v53  ;;  %v730_v0 = vld [vmem:[#allocation2 + $0x30] sm:$0xff] }
 0x1fe   : > { %v728_v63 = vld [vmem:[#allocation2 + $0x20] sm:$0xff] }
 0x1ff   : > { %1234 = vmatmul.mubr.msk.f32.gmra.mxu1 %vm330_vm0, %v727_v60  ;;  %1297 = vrcp.f32 %v728_v63 }
 0x200   : > { %1236 = vmatprep.mubr.msk.f32.mxu1 %vm330_vm0, %v728_v63  ;;  %1299 = vrcp.f32 %v730_v0  ;;  %v731_v4 = vld [vmem:[#allocation2 + $0x38] sm:$0xff] }
 0x202   : > { %v1290_v1 = vpop.eup %1289  ;;  %v729_v2 = vld [vmem:[#allocation2 + $0x28] sm:$0xff] }
 0x203   : > { %888 = vperm.xlu1 %1271, %v1290_v1   ;;  %1301 = vrcp.f32 %v729_v2  ;;  %1237 = vmatmul.mubr.msk.f32.gmra.mxu1 %vm330_vm0, %v729_v2 }
 0x204   : > { %v1292_v3 = vpop.eup %1291  ;;  %1239 = vmatprep.mubr.msk.f32.mxu1 %vm330_vm0, %v730_v0  ;;  %1303 = vrcp.f32 %v731_v4 }
 0x205   : > { %878 = vperm.xlu0 %1272, %v1292_v3  }
 0x206   : > { %v1294_v5 = vpop.eup %1293 }
 0x207   : > { %1240 = vmatmul.mubr.msk.f32.gmra.mxu1 %vm330_vm0, %v731_v4 }
 0x208   : > { %v1296_v6 = vpop.eup %1295 }
 0x209   : > { %893 = vperm.xlu0 %1272, %v1294_v5   ;;  %883 = vperm.xlu1 %1271, %v1296_v6  }
 0x20c   : > { %v1298_v7 = vpop.eup %1297 }
 0x20d   : > { %898 = vperm.xlu1 %1271, %v1298_v7   ;;  %v1300_v8 = vpop.eup %1299 }
 0x210   : > { %v1302_v9 = vpop.eup %1301 }
 0x211   : > { %908 = vperm.xlu1 %1271, %v1300_v8   ;;  %903 = vperm.xlu0 %1272, %v1302_v9   ;;  %v1304_v10 = vpop.eup %1303 }
 0x215   : > { %913 = vperm.xlu0 %1272, %v1304_v10  }
 0x27e   : > { %v889_v11 = vpop.permute.xlu1 %888 }
 0x280   : > { %v879_v12 = vpop.permute.xlu0 %878 }
 0x284   : > { %v884_v13 = vpop.permute.xlu1 %883  ;;  %v894_v17 = vpop.permute.xlu0 %893 }
 0x288   : > { %v899_v30 = vpop.permute.xlu1 %898 }
 0x28c   : > { %v904_v25 = vpop.permute.xlu0 %903  ;;  %v909_v44 = vpop.permute.xlu1 %908 }
 0x290   : > { %v914_v39 = vpop.permute.xlu0 %913 }
 0x2bb   : > { %v1232_v14 = vpop.f32.mrf.mxu1 }
 0x2bc   : > { %v917_v16 = vmul.f32 %v1232_v14, %v884_v13 }
 0x2bd   : > { %v837_v18 = vpop.f32.mrf.mxu1 }
 0x2be   : > { %v932_v19 = vadd.f32 %v1106_v15, %v917_v16  ;;  %v916_v20 = vmul.f32 %v879_v12, %v837_v18 }
 0x2bf   : > { %v1235_v21 = vpop.f32.mrf.mxu1 }
 0x2c0   : > { %v940_v22 = vmax.f32 %v932_v19, 0.0  ;;  %v931_v23 = vadd.f32 %v1106_v15, %v916_v20  ;;  %v919_v24 = vmul.f32 %v1235_v21, %v894_v17 }
 0x2c1   : > { %v847_v26 = vpop.f32.mrf.mxu1 }
 0x2c2   : > { %948 = vst [vmem:[%s1561_s14 + $0x8] sm:$0xff] %v940_v22  ;;  %v939_v27 = vmax.f32 %v931_v23, 0.0  ;;  %v934_v28 = vadd.f32 %v1106_v15, %v919_v24  ;;  %v918_v29 = vmul.f32 %v889_v11, %v847_v26 }
 0x2c3   : > { %v1238_v31 = vpop.f32.mrf.mxu1 }
 0x2c4   : > { %947 = vst [vmem:[%s1561_s14] sm:$0xff] %v939_v27  ;;  %v942_v32 = vmax.f32 %v934_v28, 0.0  ;;  %v933_v33 = vadd.f32 %v1106_v15, %v918_v29  ;;  %v921_v34 = vmul.f32 %v1238_v31, %v904_v25 }
 0x2c5   : > { %v857_v35 = vpop.f32.mrf.mxu1 }
 0x2c6   : > { %950 = vst [vmem:[%s1561_s14 + $0x18] sm:$0xff] %v942_v32  ;;  %v941_v36 = vmax.f32 %v933_v33, 0.0  ;;  %v936_v37 = vadd.f32 %v1106_v15, %v921_v34  ;;  %v920_v38 = vmul.f32 %v899_v30, %v857_v35 }
 0x2c7   : > { %v1241_v40 = vpop.f32.mrf.mxu1 }
 0x2c8   : > { %949 = vst [vmem:[%s1561_s14 + $0x10] sm:$0xff] %v941_v36  ;;  %v944_v41 = vmax.f32 %v936_v37, 0.0  ;;  %v935_v42 = vadd.f32 %v1106_v15, %v920_v38  ;;  %v923_v43 = vmul.f32 %v1241_v40, %v914_v39 }
 0x2c9   : > { %v867_v45 = vpop.f32.mrf.mxu1 }
 0x2ca   : > { %952 = vst [vmem:[%s1561_s14 + $0x28] sm:$0xff] %v944_v41  ;;  %v943_v46 = vmax.f32 %v935_v42, 0.0  ;;  %v938_v47 = vadd.f32 %v1106_v15, %v923_v43  ;;  %v922_v48 = vmul.f32 %v909_v44, %v867_v45 }
 0x2cc   : > { %951 = vst [vmem:[%s1561_s14 + $0x20] sm:$0xff] %v943_v46  ;;  %v946_v49 = vmax.f32 %v938_v47, 0.0  ;;  %v937_v50 = vadd.f32 %v1106_v15, %v922_v48 }
 0x2ce   : > { %954 = vst [vmem:[%s1561_s14 + $0x38] sm:$0xff] %v946_v49  ;;  %v945_v51 = vmax.f32 %v937_v50, 0.0 }
 0x2d0   : > { %953 = vst [vmem:[%s1561_s14 + $0x30] sm:$0xff] %v945_v51 }
 0x2d1 PF: > { %s16_s23 = sadd.s32 1, %s1327_s23   ;;  %s1587_s21 = smov %s1323_s22 }
 0x2d2   : > { %p13_p5 = scmp.ge.s32.totalorder %s16_s23, 4   ;;  %s1588_s22 = smov %s1590_s24 }
 0x2d4   :  { %15 = sbr.rel (!%p13_p5) target bundleno = 2 (0x2), region = 91 }

</bundles_post_ra>
